<compile_context>
chip_gen: v7x
topology: tpu7x:2x2x1
jax: 0.10.0
libtpu: 0.0.40
codegen_flags: <defaults>
</compile_context>

<pallas_src>
import functools
import math

import jax
import jax.numpy as jnp
from jax import lax
from jax.experimental import pallas as pl
from jax.experimental.pallas import tpu as pltpu

LATENT_DIM = 16
HIDDEN = 512
OUT_DIM = 125  # 5 * 5 * 5

_INV_SQRT2 = 1.0 / math.sqrt(2.0)
_GELU_C = math.sqrt(2.0 / math.pi)


def _decoder_kernel(z_ref, w1_ref, b1_ref, w2_ref, b2_ref, o_ref, *,
                    approx_gelu, bf16_gelu):
    # z_ref:  (bm, latent_dim)
    # w1_ref: (latent_dim, hidden)         b1_ref: (1, hidden)
    # w2_ref: (hidden, out_dim_padded)     b2_ref: (1, out_dim_padded)
    # o_ref:  (bm, out_dim)  -- 125 wide, stored directly (masked vst, 125/128 dense)
    z = z_ref[...]

    # fc1: z @ W1 + b1 (MXU, f32 accumulation; bias add in f32).
    h = jnp.dot(z, w1_ref[...], preferred_element_type=jnp.float32) + b1_ref[...]

    if bf16_gelu:
        # bf16 VALU/EUP on v6e/v7x packs 2 elems/lane -> ~2x less vector work for
        # the activation.  No benefit on v5e (no bf16 VPU) — leave False there.
        h = h.astype(jnp.bfloat16)

    if approx_gelu:
        # tanh-approx GELU: transcendental goes to the EUP slot (separately issued,
        # effectively free) instead of erf's VALU polynomial.
        h = 0.5 * h * (1.0 + jnp.tanh(_GELU_C * (h + 0.044715 * (h * h * h))))
    else:
        # exact GELU (PyTorch nn.GELU default, approximate='none'):
        # 0.5 * x * (1 + erf(x / sqrt(2)))
        h = 0.5 * h * (1.0 + lax.erf(h * _INV_SQRT2))

    # fc2: h @ W2 + b2 (MXU, f32 accumulation).  Cast h to W2's dtype so the bf16
    # weight path actually hits the bf16 MXU (no-op when weights are f32).
    out = (
        jnp.dot(h.astype(w2_ref.dtype), w2_ref[...],
                preferred_element_type=jnp.float32)
        + b2_ref[...]
    )
    # Drop the zero-padded MXU columns in-register; store 125-wide directly.
    o_ref[...] = out[:, : o_ref.shape[1]].astype(o_ref.dtype)


def prepare_params(w1, b1, w2, b2, *, use_bf16_matmul=False):
    """One-time parameter packing (call once, reuse every forward):
    biases as (1, n) rows; W2/b2 zero-padded to the next multiple of 128 so fc2
    is a lane-dense N=128 MXU tile; optional bf16 cast for the matmul inputs."""
    hidden = w1.shape[1]
    out_dim = w2.shape[1]
    pad = (-out_dim) % 128
    w2_p = jnp.pad(w2, ((0, 0), (0, pad)))
    b2_p = jnp.pad(b2, ((0, pad),)).reshape(1, out_dim + pad)
    b1_2d = b1.reshape(1, hidden)
    if use_bf16_matmul:
        w1 = w1.astype(jnp.bfloat16)
        w2_p = w2_p.astype(jnp.bfloat16)
    return dict(w1=w1, b1=b1_2d, w2=w2_p, b2=b2_p, out_dim=out_dim)


def _default_bm(batch):
    """Row-tile size.  Single block up to 1024 rows (amortizes the ~0.35 us per
    grid-step overhead; no forced 2-step split on single-TC v5e/v6e).  Beyond
    1024 rows, tile at 1024 (sublane-aligned) so the 'parallel' axis has >=2
    steps for v7x's two TensorCores, each step still >=512 rows of compute."""
    # TODO(synk): could query pltpu.get_tpu_info() to pick per-generation tiles.
    if batch <= 1024:
        return batch
    return 1024


def mlp_decoder_5x5x5(z, params, *, bm=None, approx_gelu=False, bf16_gelu=False):
    """z: (B, latent_dim) -> (B, 1, 5, 5, 5).  `params` from prepare_params()."""
    B, ld = z.shape
    w1, b1, w2, b2 = params["w1"], params["b1"], params["w2"], params["b2"]
    out_dim = params["out_dim"]
    hidden = w1.shape[1]
    out_dim_p = w2.shape[1]
    assert ld == w1.shape[0]
    if bm is None:
        bm = _default_bm(B)

    if w1.dtype == jnp.bfloat16:
        z = z.astype(jnp.bfloat16)

    flops = 2 * B * (ld * hidden + hidden * out_dim_p)
    bytes_accessed = (
        B * ld * z.dtype.itemsize
        + w1.size * w1.dtype.itemsize + b1.size * 4
        + w2.size * w2.dtype.itemsize + b2.size * 4
        + B * out_dim * 4
    )

    kernel = functools.partial(
        _decoder_kernel, approx_gelu=approx_gelu, bf16_gelu=bf16_gelu)

    out = pl.pallas_call(
        kernel,
        out_shape=jax.ShapeDtypeStruct((B, out_dim), jnp.float32),
        grid_spec=pltpu.PrefetchScalarGridSpec(
            num_scalar_prefetch=0,
            grid=(pl.cdiv(B, bm),),
            in_specs=[
                pl.BlockSpec((bm, ld), lambda i: (i, 0)),             # z tile
                pl.BlockSpec((ld, hidden), lambda i: (0, 0)),         # W1 (VMEM-resident)
                pl.BlockSpec((1, hidden), lambda i: (0, 0)),          # b1
                pl.BlockSpec((hidden, out_dim_p), lambda i: (0, 0)),  # W2 (resident, padded)
                pl.BlockSpec((1, out_dim_p), lambda i: (0, 0)),       # b2 (padded)
            ],
            out_specs=pl.BlockSpec((bm, out_dim), lambda i: (i, 0)),  # 125-wide store
        ),
        compiler_params=pltpu.CompilerParams(
            dimension_semantics=("parallel",),
        ),
        cost_estimate=pl.CostEstimate(
            flops=flops,
            transcendentals=B * hidden,
            bytes_accessed=bytes_accessed,
        ),
    )(z, w1, b1, w2, b2)

    # Free reshape to match the module's .view(-1, 1, 5, 5, 5) — no slice copy.
    return out.reshape(-1, 1, 5, 5, 5)


def init_params(key, latent_dim=LATENT_DIM, hidden=HIDDEN, out_dim=OUT_DIM):
    """Deterministic init mimicking nn.Linear's uniform(-1/sqrt(fan_in), 1/sqrt(fan_in))."""
    k1, k2, k3, k4 = jax.random.split(key, 4)
    bound1 = 1.0 / math.sqrt(latent_dim)
    bound2 = 1.0 / math.sqrt(hidden)
    # Stored as (in, out) — transpose of PyTorch's (out, in) layout.
    w1 = jax.random.uniform(k1, (latent_dim, hidden), jnp.float32, -bound1, bound1)
    b1 = jax.random.uniform(k2, (hidden,), jnp.float32, -bound1, bound1)
    w2 = jax.random.uniform(k3, (hidden, out_dim), jnp.float32, -bound2, bound2)
    b2 = jax.random.uniform(k4, (out_dim,), jnp.float32, -bound2, bound2)
    return w1, b1, w2, b2


def _reference(z, w1, b1, w2, b2, *, approx_gelu=False):
    h = z @ w1 + b1
    if approx_gelu:
        h = 0.5 * h * (1.0 + jnp.tanh(_GELU_C * (h + 0.044715 * h ** 3)))
    else:
        h = 0.5 * h * (1.0 + lax.erf(h * _INV_SQRT2))
    out = h @ w2 + b2
    return out.reshape(-1, 1, 5, 5, 5)


if __name__ == "__main__":
    key = jax.random.PRNGKey(0)
    kz, kz2, kp = jax.random.split(key, 3)
    w1, b1, w2, b2 = init_params(kp)

    # Exact-parity parameters (f32, erf GELU) — defaults match the PyTorch module.
    params = prepare_params(w1, b1, w2, b2)

    # Case 1: tiny batch, single-block grid.
    B1 = 8
    z1 = jax.random.normal(kz, (B1, LATENT_DIM), dtype=jnp.float32)
    out1 = jax.block_until_ready(mlp_decoder_5x5x5(z1, params))
    assert out1.shape == (B1, 1, 5, 5, 5), out1.shape
    ref1 = _reference(z1, w1, b1, w2, b2)
    assert jnp.allclose(out1, ref1, atol=1e-4, rtol=1e-4), float(
        jnp.max(jnp.abs(out1 - ref1)))

    # Case 2: non-multiple-of-8 batch, single full-dim block.
    B2 = 40
    z2 = jax.random.normal(kz2, (B2, LATENT_DIM), dtype=jnp.float32)
    out2 = jax.block_until_ready(mlp_decoder_5x5x5(z2, params))
    assert out2.shape == (B2, 1, 5, 5, 5), out2.shape
    ref2 = _reference(z2, w1, b1, w2, b2)
    assert jnp.allclose(out2, ref2, atol=1e-4, rtol=1e-4), float(
        jnp.max(jnp.abs(out2 - ref2)))

    # Case 3: multi-step 'parallel' grid with a partial last block (forced small bm).
    out2b = jax.block_until_ready(mlp_decoder_5x5x5(z2, params, bm=16))
    assert jnp.allclose(out2b, ref2, atol=1e-4, rtol=1e-4), float(
        jnp.max(jnp.abs(out2b - ref2)))

    # Case 4: fast path (bf16 MXU inputs + tanh-approx GELU) — looser tolerance,
    # compared against the matching approx-GELU f32 reference.
    fast_params = prepare_params(w1, b1, w2, b2, use_bf16_matmul=True)
    out_fast = jax.block_until_ready(
        mlp_decoder_5x5x5(z2, fast_params, approx_gelu=True))
    assert out_fast.shape == (B2, 1, 5, 5, 5), out_fast.shape
    ref_fast = _reference(z2, w1, b1, w2, b2, approx_gelu=True)
    assert jnp.allclose(out_fast, ref_fast, atol=5e-2, rtol=5e-2), float(
        jnp.max(jnp.abs(out_fast - ref_fast)))

    print("KERNEL_OK")
</pallas_src>

<mosaic_0001>
module attributes {stable_mosaic.version = 11 : i64} {
  func.func @_decoder_kernel(%arg0: i32, %arg1: memref<8x16xf32, #tpu.memory_space<vmem>>, %arg2: memref<16x512xf32, #tpu.memory_space<vmem>>, %arg3: memref<1x512xf32, #tpu.memory_space<vmem>>, %arg4: memref<512x128xf32, #tpu.memory_space<vmem>>, %arg5: memref<1x128xf32, #tpu.memory_space<vmem>>, %arg6: memref<8x125xf32, #tpu.memory_space<vmem>>) attributes {dimension_semantics = [#tpu.dimension_semantics<parallel>], iteration_bounds = array<i64: 1>, scalar_prefetch = 0 : i64, scratch_operands = 0 : i64, tpu.core_type = #tpu.core_type<tc>, window_params = [{transform_indices = @transform_0, window_bounds = array<i64: 8, 16>}, {pipeline_mode = #tpu.pipeline_mode<synchronous>, transform_indices = @transform_1, window_bounds = array<i64: 16, 512>}, {pipeline_mode = #tpu.pipeline_mode<synchronous>, transform_indices = @transform_2, window_bounds = array<i64: 1, 512>}, {pipeline_mode = #tpu.pipeline_mode<synchronous>, transform_indices = @transform_3, window_bounds = array<i64: 512, 128>}, {pipeline_mode = #tpu.pipeline_mode<synchronous>, transform_indices = @transform_4, window_bounds = array<i64: 1, 128>}, {transform_indices = @transform_5, window_bounds = array<i64: 8, 125>}]} {
    %c0 = arith.constant 0 : index
    %c0_0 = arith.constant 0 : index
    %0 = vector.load %arg1[%c0, %c0_0] : memref<8x16xf32, #tpu.memory_space<vmem>>, vector<8x16xf32>
    %c0_1 = arith.constant 0 : index
    %c0_2 = arith.constant 0 : index
    %1 = vector.load %arg2[%c0_1, %c0_2] : memref<16x512xf32, #tpu.memory_space<vmem>>, vector<16x512xf32>
    %cst = arith.constant dense<0.000000e+00> : vector<8x512xf32>
    %2 = tpu.matmul %0, %1, %cst {dimension_numbers = #tpu.dot_dimension_numbers<[1], [0], [0], [1], [0, 0, 1, 1], [], []>} : vector<8x16xf32>, vector<16x512xf32>, vector<8x512xf32> -> vector<8x512xf32>
    %c0_3 = arith.constant 0 : index
    %c0_4 = arith.constant 0 : index
    %3 = vector.load %arg3[%c0_3, %c0_4] : memref<1x512xf32, #tpu.memory_space<vmem>>, vector<1x512xf32>
    %4 = vector.broadcast %3 : vector<1x512xf32> to vector<8x512xf32>
    %5 = arith.addf %2, %4 : vector<8x512xf32>
    %cst_5 = arith.constant 5.000000e-01 : f32
    %6 = vector.broadcast %cst_5 : f32 to vector<8x512xf32>
    %7 = arith.mulf %6, %5 : vector<8x512xf32>
    %cst_6 = arith.constant 0.707106769 : f32
    %8 = vector.broadcast %cst_6 : f32 to vector<8x512xf32>
    %9 = arith.mulf %5, %8 : vector<8x512xf32>
    %10 = math.erf %9 : vector<8x512xf32>
    %cst_7 = arith.constant 1.000000e+00 : f32
    %11 = vector.broadcast %cst_7 : f32 to vector<8x512xf32>
    %12 = arith.addf %11, %10 : vector<8x512xf32>
    %13 = arith.mulf %7, %12 : vector<8x512xf32>
    %c0_8 = arith.constant 0 : index
    %c0_9 = arith.constant 0 : index
    %14 = vector.load %arg4[%c0_8, %c0_9] : memref<512x128xf32, #tpu.memory_space<vmem>>, vector<512x128xf32>
    %cst_10 = arith.constant dense<0.000000e+00> : vector<8x128xf32>
    %15 = tpu.matmul %13, %14, %cst_10 {dimension_numbers = #tpu.dot_dimension_numbers<[1], [0], [0], [1], [0, 0, 1, 1], [], []>} : vector<8x512xf32>, vector<512x128xf32>, vector<8x128xf32> -> vector<8x128xf32>
    %c0_11 = arith.constant 0 : index
    %c0_12 = arith.constant 0 : index
    %16 = vector.load %arg5[%c0_11, %c0_12] : memref<1x128xf32, #tpu.memory_space<vmem>>, vector<1x128xf32>
    %17 = vector.broadcast %16 : vector<1x128xf32> to vector<8x128xf32>
    %18 = arith.addf %15, %17 : vector<8x128xf32>
    %19 = vector.extract_strided_slice %18 {offsets = [0, 0], sizes = [8, 125], strides = [1, 1]} : vector<8x128xf32> to vector<8x125xf32>
    %c0_13 = arith.constant 0 : index
    %c0_14 = arith.constant 0 : index
    %20 = vector.load %arg6[%c0_13, %c0_14] : memref<8x125xf32, #tpu.memory_space<vmem>>, vector<8x125xf32>
    tpu.vector_store %arg6[%c0_13, %c0_14], %19 {strides = array<i32>} : memref<8x125xf32, #tpu.memory_space<vmem>>, vector<8x125xf32>,
    return
  }
  func.func @transform_0(%arg0: i32) -> (i32, i32) {
    %c0_i32 = arith.constant 0 : i32
    %c0_i32_0 = arith.constant 0 : i32
    return %arg0, %c0_i32 : i32, i32
  }
  func.func @transform_1(%arg0: i32) -> (i32, i32) {
    %c0_i32 = arith.constant 0 : i32
    %c0_i32_0 = arith.constant 0 : i32
    %c0_i32_1 = arith.constant 0 : i32
    return %c0_i32, %c0_i32_0 : i32, i32
  }
  func.func @transform_2(%arg0: i32) -> (i32, i32) {
    %c0_i32 = arith.constant 0 : i32
    %c0_i32_0 = arith.constant 0 : i32
    %c0_i32_1 = arith.constant 0 : i32
    return %c0_i32, %c0_i32_0 : i32, i32
  }
  func.func @transform_3(%arg0: i32) -> (i32, i32) {
    %c0_i32 = arith.constant 0 : i32
    %c0_i32_0 = arith.constant 0 : i32
    %c0_i32_1 = arith.constant 0 : i32
    return %c0_i32, %c0_i32_0 : i32, i32
  }
  func.func @transform_4(%arg0: i32) -> (i32, i32) {
    %c0_i32 = arith.constant 0 : i32
    %c0_i32_0 = arith.constant 0 : i32
    %c0_i32_1 = arith.constant 0 : i32
    return %c0_i32, %c0_i32_0 : i32, i32
  }
  func.func @transform_5(%arg0: i32) -> (i32, i32) {
    %c0_i32 = arith.constant 0 : i32
    %c0_i32_0 = arith.constant 0 : i32
    return %arg0, %c0_i32 : i32, i32
  }
}

</mosaic_0001>

<bundles_post_ra>
// kernel: tpu_custom_call.1
= control target key start
LH: loop header
LB: loop body
LE: loop exit
PB: predicated region body
PF: predicated region fallthrough
CT: control target
= control target key end

     0   :  { %10 = vsyncpa [#allocation3], 0  ;;  %s837_s0 = inlined_call_operand.hbm [shape: f32[8,16], index: 0, kind: input, shape index: {}]   ;;  %s838_s1 = inlined_call_operand.hbm [shape: f32[16,512], index: 1, kind: input, shape index: {}]   ;;  %s839_s2 = inlined_call_operand.vmem [shape: f32[1,512], index: 2, kind: input, shape index: {}]   ;;  %s840_s3 = inlined_call_operand.hbm [shape: f32[512,128], index: 3, kind: input, shape index: {}]   ;;  %s841_s4 = inlined_call_operand.vmem [shape: f32[1,128], index: 4, kind: input, shape index: {}]   ;;  %s842_s5 = inlined_call_operand.hbm [shape: f32[8,125], index: 5, kind: output, shape index: {}]  }
   0x1   :  { %11 = vsyncpa [#allocation6], 0 }
   0x2   :  { %12 = vsyncpa [#allocation4], 0  ;;  %s742_s18 = smov [#allocation5]   ;;  %s648_s22 = scalar_lea.hbm %s838_s1, 1024 }
   0x3   :  { %s28_s19 = sshll.u32 %s742_s18, 4  ;;  %p649_p0 = scmp.ne.s32.totalorder %s838_s1, %s648_s22  ;;  %s29_s19 = int_to_ptr.vmem [resolvable:$true] %s28_s19 }
   0x4   :  { %p652_p1 = scmp.lt.u32.totalorder %s648_s22, %s838_s1 }
   0x6   :  { %p654_p2 = pnand %p652_p1, %p649_p0 }
   0x8   :  { %657 = shalt.err (!%p654_p2)
}
   0x9   :  { %s658_s27 = scalar_lea.vmem %s29_s19, 1024  ;;  %p663_p4 = scmp.lt.s32.totalorder %s29_s19, %s29_s19 }
   0xa   :  { %p659_p3 = scmp.ne.s32.totalorder %s29_s19, %s658_s27  ;;  %p664_p5 = scmp.lt.s32.totalorder %s658_s27, %s658_s27 }
   0xc   :  { %p665_p6 = por %p664_p5, %p663_p4 }
   0xe   :  { %p666_p7 = pnand %p665_p6, %p659_p3 }
  0x10   :  { %669 = shalt.err (!%p666_p7)
}
  0x11   :  { %s743_s28 = smov 512   ;;  %s744_s29 = smov 32  }
  0x12   :  { %34 = dma.hbm_to_vmem [thread:$0]  %s838_s1, 1024, %s29_s19, [#allocation6], %s743_s28, %s743_s28, %s744_s29  }
  0x13   :  { %s745_s7 = smov [#allocation2]   ;;  %s746_s9 = smov [#allocation7]  }
  0x14   :  { %s19_s8 = sshll.u32 %s745_s7, 4  ;;  %s42_s10 = sshll.u32 %s746_s9, 4  ;;  %s20_s8 = int_to_ptr.vmem [resolvable:$true] %s19_s8  ;;  %s43_s10 = int_to_ptr.vmem [resolvable:$true] %s42_s10 }
  0x15   :  { %s670_s13 = scalar_lea.hbm %s837_s0, 128 }
  0x16   :  { %p671_p8 = scmp.ne.s32.totalorder %s837_s0, %s670_s13  ;;  %p674_p9 = scmp.lt.u32.totalorder %s670_s13, %s837_s0 }
  0x18   :  { %p676_p10 = pnand %p674_p9, %p671_p8 }
  0x1a   :  { %679 = shalt.err (!%p676_p10)
}
  0x1b   :  { %s680_s1 = scalar_lea.vmem %s20_s8, 128  ;;  %p685_p12 = scmp.lt.s32.totalorder %s20_s8, %s20_s8 }
  0x1c   :  { %p681_p11 = scmp.ne.s32.totalorder %s20_s8, %s680_s1  ;;  %p686_p13 = scmp.lt.s32.totalorder %s680_s1, %s680_s1 }
  0x1e   :  { %p687_p0 = por %p686_p13, %p685_p12 }
  0x20   :  { %p688_p1 = pnand %p687_p0, %p681_p11 }
  0x22   :  { %691 = shalt.err (!%p688_p1)
}
  0x23   :  { %22 = dma.hbm_to_vmem [thread:$0]  %s837_s0, 128, %s20_s8, [#allocation3]  }
  0x24   :  { %s692_s22 = scalar_lea.hbm %s840_s3, 8192 }
  0x25   :  { %p693_p2 = scmp.ne.s32.totalorder %s840_s3, %s692_s22  ;;  %p696_p3 = scmp.lt.u32.totalorder %s692_s22, %s840_s3 }
  0x27   :  { %p698_p4 = pnand %p696_p3, %p693_p2 }
  0x29   :  { %701 = shalt.err (!%p698_p4)
}
  0x2a   :  { %s702_s27 = scalar_lea.vmem %s43_s10, 8192  ;;  %p707_p6 = scmp.lt.s32.totalorder %s43_s10, %s43_s10 }
  0x2b   :  { %p703_p5 = scmp.ne.s32.totalorder %s43_s10, %s702_s27  ;;  %p708_p7 = scmp.lt.s32.totalorder %s702_s27, %s702_s27 }
  0x2d   :  { %p709_p8 = por %p708_p7, %p707_p6 }
  0x2f   :  { %p710_p9 = pnand %p709_p8, %p703_p5 }
  0x31   :  { %713 = shalt.err (!%p710_p9)
}
  0x32   :  { %s747_s0 = smov 128   ;;  %s748_s28 = smov 8  }
  0x33   :  { %48 = dma.hbm_to_vmem [thread:$0]  %s840_s3, 8192, %s43_s10, [#allocation6], %s747_s0, %s747_s0, %s748_s28  }
  0x34   :  { %736 = dma.done.wait [#allocation3], 128  }
  0x35   :  { %737 = vsyncadd [#allocation3], 4294967168 }
  0x36   :  { %738 = dma.done.wait [#allocation6], 9216  }
  0x37   :  { %739 = vsyncadd [#allocation6], 4294958080  ;;  %v749_v0 = vmov 0.0   ;;  %v62_v1 = vld [vmem:[#allocation5 + $0x8] sm:$0xff]  ;;  %v64_v3 = vld [vmem:[#allocation5 + $0x18] sm:$0xff]  ;;  %vm91_vm0 = vcmask 130048  }
  0x38   :  { %159 = vmatprep.mubr.f32.mxu0 %v749_v0  ;;  %230 = vmatprep.mubr.f32.mxu1 %v749_v0  ;;  %v66_v2 = vld [vmem:[#allocation5 + $0x28] sm:$0xff]  ;;  %v68_v5 = vld [vmem:[#allocation5 + $0x38] sm:$0xff]  ;;  %v61_v6 = vld [vmem:[#allocation5] sm:$0xff]  ;;  %s750_s8 = smov [#allocation8]   ;;  %vm468_vm1 = vcmask 1022976  }
  0x39   :  { %v559_v4 = vpack.c.bf16 %v66_v2, %v62_v1  ;;  %v65_v7 = vld [vmem:[#allocation5 + $0x20] sm:$0xff]  ;;  %v563_v8 = vpack.c.bf16 %v68_v5, %v64_v3  ;;  %v63_v10 = vld [vmem:[#allocation5 + $0x10] sm:$0xff]  ;;  %v60_v12 = vld [vmem:[#allocation2] sm:$0xff]  ;;  %s476_s9 = sshll.u32 %s750_s8, 4  ;;  %s477_s9 = int_to_ptr.vmem [resolvable:$true] %s476_s9 }
  0x3a   :  { %v561_v9 = vpack.c.bf16 %v65_v7, %v61_v6  ;;  %v67_v11 = vld [vmem:[#allocation5 + $0x30] sm:$0xff]  ;;  %v273_v14 = vld [vmem:[#allocation7 + $0x80] sm:$0xff]  ;;  %v274_v15 = vld [vmem:[#allocation7 + $0x88] sm:$0xff]  ;;  %s714_s10 = scalar_lea.vmem %s477_s9, 128  ;;  %p719_p11 = scmp.lt.s32.totalorder %s477_s9, %s477_s9 }
  0x3b   :  { %560 = vmatprep.subr.bf16.mxu0 %v559_v4  ;;  %v565_v13 = vpack.c.bf16 %v67_v11, %v63_v10  ;;  %v305_v16 = vld [vmem:[#allocation7 + $0x180] sm:$0xff]  ;;  %564 = vmatprep.subr.bf16.mxu1 %v563_v8  ;;  %v567_v17 = vpack.c.bf16 %v274_v15, %v273_v14  ;;  %v306_v18 = vld [vmem:[#allocation7 + $0x188] sm:$0xff]  ;;  %v275_v25 = vld [vmem:[#allocation7 + $0x90] sm:$0xff]  ;;  %p715_p10 = scmp.ne.s32.totalorder %s477_s9, %s714_s10  ;;  %p720_p12 = scmp.lt.s32.totalorder %s714_s10, %s714_s10 }
  0x3c   :  { %562 = vmatpush1.bf16.msra.mxu0 %v561_v9  ;;  %v257_v19 = vld [vmem:[#allocation7] sm:$0xff]  ;;  %v258_v20 = vld [vmem:[#allocation7 + $0x8] sm:$0xff]  ;;  %v599_v21 = vpack.c.bf16 %v306_v18, %v305_v16  ;;  %v276_v27 = vld [vmem:[#allocation7 + $0x98] sm:$0xff] }
  0x3d   :  { %566 = vmatpush1.bf16.msra.mxu1 %v565_v13  ;;  %v569_v22 = vpack.c.bf16 %v258_v20, %v257_v19  ;;  %v289_v23 = vld [vmem:[#allocation7 + $0x100] sm:$0xff]  ;;  %v290_v24 = vld [vmem:[#allocation7 + $0x108] sm:$0xff]  ;;  %568 = vmatprep.subr.bf16.mxu0 %v567_v17  ;;  %v307_v28 = vld [vmem:[#allocation7 + $0x190] sm:$0xff]  ;;  %v571_v30 = vpack.c.bf16 %v276_v27, %v275_v25  ;;  %p721_p13 = por %p720_p12, %p719_p11 }
  0x3e   :  { %v601_v26 = vpack.c.bf16 %v290_v24, %v289_v23  ;;  %v308_v29 = vld [vmem:[#allocation7 + $0x198] sm:$0xff]  ;;  %600 = vmatprep.subr.bf16.mxu1 %v599_v21  ;;  %v259_v32 = vld [vmem:[#allocation7 + $0x10] sm:$0xff]  ;;  %v277_v37 = vld [vmem:[#allocation7 + $0xa0] sm:$0xff] }
  0x3f   :  { %486 = vmatmul.mubr.msk.f32.vlgmr.msra.gmra.mrb[0].mxu0 %vm91_vm0, %v60_v12  ;;  %v603_v31 = vpack.c.bf16 %v308_v29, %v307_v28  ;;  %v260_v33 = vld [vmem:[#allocation7 + $0x18] sm:$0xff]  ;;  %v291_v34 = vld [vmem:[#allocation7 + $0x110] sm:$0xff]  ;;  %v278_v38 = vld [vmem:[#allocation7 + $0xa8] sm:$0xff]  ;;  %p722_p0 = pnand %p721_p13, %p715_p10 }
  0x40   :  { %487 = vmatmul.mubr.msk.f32.vlgmr.msra.gmra.mrb[0].mxu1 %vm91_vm0, %v60_v12  ;;  %570 = vmatpush3.bf16.msra.mxu0 %v569_v22  ;;  %v573_v35 = vpack.c.bf16 %v260_v33, %v259_v32  ;;  %v292_v36 = vld [vmem:[#allocation7 + $0x118] sm:$0xff]  ;;  %v575_v40 = vpack.c.bf16 %v278_v38, %v277_v37  ;;  %v309_v41 = vld [vmem:[#allocation7 + $0x1a0] sm:$0xff]  ;;  %v310_v42 = vld [vmem:[#allocation7 + $0x1a8] sm:$0xff] }
  0x41   :  { %602 = vmatpush3.bf16.msra.mxu1 %v601_v26  ;;  %572 = vmatprep.subr.bf16.mxu0 %v571_v30  ;;  %v605_v39 = vpack.c.bf16 %v292_v36, %v291_v34  ;;  %v261_v43 = vld [vmem:[#allocation7 + $0x20] sm:$0xff]  ;;  %v607_v44 = vpack.c.bf16 %v310_v42, %v309_v41  ;;  %v262_v45 = vld [vmem:[#allocation7 + $0x28] sm:$0xff]  ;;  %v279_v50 = vld [vmem:[#allocation7 + $0xb0] sm:$0xff] }
  0x42   :  { %604 = vmatprep.subr.bf16.mxu1 %v603_v31  ;;  %v293_v46 = vld [vmem:[#allocation7 + $0x120] sm:$0xff]  ;;  %v294_v47 = vld [vmem:[#allocation7 + $0x128] sm:$0xff]  ;;  %v577_v48 = vpack.c.bf16 %v262_v45, %v261_v43  ;;  %v280_v51 = vld [vmem:[#allocation7 + $0xb8] sm:$0xff] }
  0x43   :  { %v609_v49 = vpack.c.bf16 %v294_v47, %v293_v46  ;;  %v311_v52 = vld [vmem:[#allocation7 + $0x1b0] sm:$0xff]  ;;  %v579_v53 = vpack.c.bf16 %v280_v51, %v279_v50  ;;  %v312_v54 = vld [vmem:[#allocation7 + $0x1b8] sm:$0xff]  ;;  %v281_v62 = vld [vmem:[#allocation7 + $0xc0] sm:$0xff]  ;;  %v71_v46 = vlaneseq }
  0x44   :  { %574 = vmatpush3.bf16.msra.mxu0 %v573_v35  ;;  %v263_v55 = vld [vmem:[#allocation7 + $0x30] sm:$0xff]  ;;  %v264_v56 = vld [vmem:[#allocation7 + $0x38] sm:$0xff]  ;;  %v611_v57 = vpack.c.bf16 %v312_v54, %v311_v52  ;;  %v282_v63 = vld [vmem:[#allocation7 + $0xc8] sm:$0xff] }
  0x45   :  { %606 = vmatpush3.bf16.msra.mxu1 %v605_v39  ;;  %576 = vmatprep.subr.bf16.mxu0 %v575_v40  ;;  %v581_v58 = vpack.c.bf16 %v264_v56, %v263_v55  ;;  %v295_v59 = vld [vmem:[#allocation7 + $0x130] sm:$0xff]  ;;  %v296_v60 = vld [vmem:[#allocation7 + $0x138] sm:$0xff]  ;;  %v313_v0 = vld [vmem:[#allocation7 + $0x1c0] sm:$0xff]  ;;  %v583_v1 = vpack.c.bf16 %v282_v63, %v281_v62  ;;  %v72_v47 = vshrl.u32 %v71_v46, 7 }
  0x46   :  { %608 = vmatprep.subr.bf16.mxu1 %v607_v44  ;;  %v613_v61 = vpack.c.bf16 %v296_v60, %v295_v59  ;;  %v314_v2 = vld [vmem:[#allocation7 + $0x1c8] sm:$0xff]  ;;  %v265_v3 = vld [vmem:[#allocation7 + $0x40] sm:$0xff]  ;;  %v283_v10 = vld [vmem:[#allocation7 + $0xd0] sm:$0xff] }
  0x47   :  { %v266_v4 = vld [vmem:[#allocation7 + $0x48] sm:$0xff]  ;;  %v615_v5 = vpack.c.bf16 %v314_v2, %v313_v0  ;;  %v297_v7 = vld [vmem:[#allocation7 + $0x140] sm:$0xff]  ;;  %v284_v11 = vld [vmem:[#allocation7 + $0xd8] sm:$0xff]  ;;  %v81_v50 = vsub.s32 2, %v72_v47  ;;  %v77_v51 = vsub.s32 1, %v72_v47  ;;  %v85_v52 = vsub.s32 3, %v72_v47 }
  0x48   :  { %578 = vmatpush3.bf16.msra.mxu0 %v577_v48  ;;  %v585_v6 = vpack.c.bf16 %v266_v4, %v265_v3  ;;  %v298_v8 = vld [vmem:[#allocation7 + $0x148] sm:$0xff]  ;;  %v315_v12 = vld [vmem:[#allocation7 + $0x1d0] sm:$0xff]  ;;  %v587_v13 = vpack.c.bf16 %v284_v11, %v283_v10  ;;  %v316_v14 = vld [vmem:[#allocation7 + $0x1d8] sm:$0xff]  ;;  %v73_v48 = vsub.s32 0, %v72_v47 }
  0x49   :  { %610 = vmatpush3.bf16.msra.mxu1 %v609_v49  ;;  %580 = vmatprep.subr.bf16.mxu0 %v579_v53  ;;  %v617_v9 = vpack.c.bf16 %v298_v8, %v297_v7  ;;  %v267_v15 = vld [vmem:[#allocation7 + $0x50] sm:$0xff]  ;;  %v268_v16 = vld [vmem:[#allocation7 + $0x58] sm:$0xff]  ;;  %v619_v17 = vpack.c.bf16 %v316_v14, %v315_v12  ;;  %v285_v22 = vld [vmem:[#allocation7 + $0xe0] sm:$0xff] }
  0x4a   :  { %612 = vmatprep.subr.bf16.mxu1 %v611_v57  ;;  %v589_v18 = vpack.c.bf16 %v268_v16, %v267_v15  ;;  %v299_v19 = vld [vmem:[#allocation7 + $0x150] sm:$0xff]  ;;  %v300_v20 = vld [vmem:[#allocation7 + $0x158] sm:$0xff]  ;;  %v286_v23 = vld [vmem:[#allocation7 + $0xe8] sm:$0xff] }
  0x4b   :  { %v621_v21 = vpack.c.bf16 %v300_v20, %v299_v19  ;;  %v317_v24 = vld [vmem:[#allocation7 + $0x1e0] sm:$0xff]  ;;  %v591_v25 = vpack.c.bf16 %v286_v23, %v285_v22  ;;  %v318_v26 = vld [vmem:[#allocation7 + $0x1e8] sm:$0xff]  ;;  %v287_v34 = vld [vmem:[#allocation7 + $0xf0] sm:$0xff] }
  0x4c   :  { %582 = vmatpush3.bf16.msra.mxu0 %v581_v58  ;;  %v269_v27 = vld [vmem:[#allocation7 + $0x60] sm:$0xff]  ;;  %v270_v28 = vld [vmem:[#allocation7 + $0x68] sm:$0xff]  ;;  %v623_v29 = vpack.c.bf16 %v318_v26, %v317_v24  ;;  %v288_v35 = vld [vmem:[#allocation7 + $0xf8] sm:$0xff] }
  0x4d   :  { %614 = vmatpush3.bf16.msra.mxu1 %v613_v61  ;;  %584 = vmatprep.subr.bf16.mxu0 %v583_v1  ;;  %v593_v30 = vpack.c.bf16 %v270_v28, %v269_v27  ;;  %v301_v31 = vld [vmem:[#allocation7 + $0x160] sm:$0xff]  ;;  %v302_v32 = vld [vmem:[#allocation7 + $0x168] sm:$0xff]  ;;  %v319_v36 = vld [vmem:[#allocation7 + $0x1f0] sm:$0xff]  ;;  %v595_v37 = vpack.c.bf16 %v288_v35, %v287_v34 }
  0x4e   :  { %616 = vmatprep.subr.bf16.mxu1 %v615_v5  ;;  %v625_v33 = vpack.c.bf16 %v302_v32, %v301_v31  ;;  %v320_v38 = vld [vmem:[#allocation7 + $0x1f8] sm:$0xff]  ;;  %v271_v39 = vld [vmem:[#allocation7 + $0x70] sm:$0xff] }
  0x4f   :  { %v272_v40 = vld [vmem:[#allocation7 + $0x78] sm:$0xff]  ;;  %v627_v41 = vpack.c.bf16 %v320_v38, %v319_v36  ;;  %v303_v43 = vld [vmem:[#allocation7 + $0x170] sm:$0xff] }
  0x50   :  { %586 = vmatpush3.bf16.msra.mxu0 %v585_v6  ;;  %v597_v42 = vpack.c.bf16 %v272_v40, %v271_v39  ;;  %v304_v44 = vld [vmem:[#allocation7 + $0x178] sm:$0xff] }
  0x51   :  { %618 = vmatpush3.bf16.msra.mxu1 %v617_v9  ;;  %588 = vmatprep.subr.bf16.mxu0 %v587_v13  ;;  %v629_v45 = vpack.c.bf16 %v304_v44, %v303_v43  ;;  %v69_v49 = vld [vmem:[%s839_s2] sm:$0xf] }
  0x52   :  { %620 = vmatprep.subr.bf16.mxu1 %v619_v17  ;;  %v74_v53 = vrot.slane %v69_v49, %v73_v48  ;;  %v82_v54 = vrot.slane %v69_v49, %v81_v50  ;;  %v78_v55 = vrot.slane %v69_v49, %v77_v51  ;;  %v86_v56 = vrot.slane %v69_v49, %v85_v52  ;;  %v488_v23 = vld [vmem:[%s841_s4] ss:$0 sm:$0xff] }
  0x54   :  { %590 = vmatpush3.bf16.msra.mxu0 %v589_v18 }
  0x55   :  { %622 = vmatpush3.bf16.msra.mxu1 %v621_v21  ;;  %592 = vmatprep.subr.bf16.mxu0 %v591_v25 }
  0x56   :  { %624 = vmatprep.subr.bf16.mxu1 %v623_v29 }
  0x58   :  { %594 = vmatpush3.bf16.msra.mxu0 %v593_v30 }
  0x59   :  { %626 = vmatpush3.bf16.msra.mxu1 %v625_v33  ;;  %596 = vmatprep.subr.bf16.mxu0 %v595_v37 }
  0x5a   :  { %628 = vmatprep.subr.bf16.mxu1 %v627_v41 }
  0x5c   :  { %598 = vmatpush3.bf16.msra.mxu0 %v597_v42 }
  0x5d   :  { %630 = vmatpush3.bf16.msra.mxu1 %v629_v45 }
 0x112   :  { %v161_v57 = vpop.f32.mrb[0].mxu0 }
 0x113   :  { %v162_v58 = vadd.f32 %v161_v57, %v74_v53  ;;  %v232_v59 = vpop.f32.mrb[0].mxu1  ;;  %v163_v60 = vpop.f32.mrb[1].mxu0 }
 0x114   :  { %v233_v61 = vadd.f32 %v232_v59, %v82_v54  ;;  %v164_v62 = vadd.f32 %v163_v60, %v78_v55  ;;  %v234_v63 = vpop.f32.mrb[1].mxu1 }
 0x115   :  { %v241_v0 = vmul.f32 0.70710677, %v162_v58  ;;  %v235_v1 = vadd.f32 %v234_v63, %v86_v56  ;;  %v237_v13 = vmul.f32 0.5, %v162_v58 }
 0x116   :  { %v243_v2 = vmul.f32 0.70710677, %v233_v61  ;;  %v242_v3 = vmul.f32 0.70710677, %v164_v62  ;;  %v238_v11 = vmul.f32 0.5, %v164_v62  ;;  %v239_v16 = vmul.f32 0.5, %v233_v61 }
 0x117   :  { %640 = verf.f32 %v241_v0  ;;  %v244_v4 = vmul.f32 0.70710677, %v235_v1  ;;  %v240_v14 = vmul.f32 0.5, %v235_v1 }
 0x118   :  { %642 = verf.f32 %v243_v2 }
 0x119   :  { %644 = verf.f32 %v242_v3 }
 0x11a   :  { %646 = verf.f32 %v244_v4 }
 0x121   :  { %v641_v5 = vpop.eup %640 }
 0x122   :  { %v643_v6 = vpop.eup %642  ;;  %v249_v8 = vadd.f32 1.0, %v641_v5 }
 0x123   :  { %v645_v7 = vpop.eup %644  ;;  %v251_v10 = vadd.f32 1.0, %v643_v6 }
 0x124   :  { %v647_v9 = vpop.eup %646  ;;  %v250_v12 = vadd.f32 1.0, %v645_v7  ;;  %v253_v18 = vmul.f32 %v249_v8, %v237_v13 }
 0x125   :  { %v252_v15 = vadd.f32 1.0, %v647_v9  ;;  %v255_v20 = vmul.f32 %v251_v10, %v239_v16 }
 0x126   :  { %v254_v17 = vmul.f32 %v250_v12, %v238_v11 }
 0x127   :  { %v256_v19 = vmul.f32 %v252_v15, %v240_v14 }
 0x128   :  { %392 = vmatprep.mubr.f32.mxu0 %v254_v17 }
 0x129   :  { %462 = vmatprep.mubr.f32.mxu1 %v256_v19  ;;  %393 = vmatmul.mubr.f32.vlgmr.msra.gmra.mrb[2].mxu0 %v253_v18 }
 0x12a   :  { %463 = vmatmul.mubr.f32.vlgmr.msra.gmra.mrb[2].mxu1 %v255_v20 }
 0x1fc   :  { %v521_v21 = vpop.f32.mrb[2].mxu0 }
 0x1fd   :  { %v556_v22 = vpop.f32.mrb[2].mxu1  ;;  %v522_v24 = vpop.f32.mrb[3].mxu0 }
 0x1fe   :  { %v523_v25 = vadd.f32 %v522_v24, %v521_v21  ;;  %v557_v26 = vpop.f32.mrb[3].mxu1 }
 0x1ff   :  { %v558_v27 = vadd.f32 %v557_v26, %v556_v22 }
 0x200   :  { %v395_v28 = vadd.f32 %v523_v25, %v488_v23 }
 0x202   :  { %v465_v29 = vadd.f32 %v558_v27, %v395_v28 }
 0x204   :  { %469 = vst.msk [vmem:[#allocation8] sm:$0xff] %vm468_vm1, %v465_v29 }
 0x205   :  { %725 = shalt.err (!%p722_p0)
}
 0x206   :  { %s726_s12 = scalar_lea.hbm %s842_s5, 128 }
 0x207   :  { %p727_p1 = scmp.ne.s32.totalorder %s842_s5, %s726_s12  ;;  %p730_p2 = scmp.lt.u32.totalorder %s726_s12, %s842_s5 }
 0x209   :  { %p732_p3 = pnand %p730_p2, %p727_p1 }
 0x20b   :  { %735 = shalt.err (!%p732_p3)
}
 0x20c   :  { %479 = dma.vmem_to_hbm [thread:$0]  %s477_s9, 128, %s842_s5, [#allocation4]  }
 0x20d   :  { %740 = dma.done.wait [#allocation4], 128  }
 0x20e   :  { %741 = vsyncadd [#allocation4], 4294967168 }
 0x20f   :  { %483 = vsyncpa [#allocation3], 1 }
 0x210   :  { %484 = vsyncpa [#allocation6], 1 }
 0x211   :  { %485 = vsyncpa [#allocation4], 1 }

</bundles_post_ra>
